<compile_context>
chip_gen: v7x
topology: tpu7x:2x2x1
jax: 0.10.0
libtpu: 0.0.40
codegen_flags: <defaults>
</compile_context>

<pallas_src>
import functools

import jax
import jax.numpy as jnp
import numpy as np
from jax.experimental import pallas as pl
from jax.experimental.pallas import tpu as pltpu

_EPS = 1e-12           # torch.nn.functional.normalize default eps
_LANE = 128
_SUBLANE_BF16 = 16     # bf16 packs 16 rows per sublane tile
_TILE_E_MAX = 4096     # exp-table tile rows (upper cap; real value VMEM-derived)
_TILE_B_MAX = 512      # batch tile rows (whole batch resident up to this)


def _round_up(x, m):
    return ((x + m - 1) // m) * m


def _cdiv(a, b):
    return -(-a // b)


def _pad_axis_to(x, size, axis):
    pad = size - x.shape[axis]
    if pad <= 0:
        return x
    widths = [(0, 0)] * x.ndim
    widths[axis] = (0, pad)
    return jnp.pad(x, widths)


def _vmem_limit_bytes():
    """Per-generation VMEM budget (with headroom for double-buffering)."""
    cap = None
    try:
        cap = getattr(pltpu.get_tpu_info(), "vmem_capacity_bytes", None)
    except Exception:
        cap = None
    if not cap:
        cap = 64 * 1024 * 1024          # conservative: v7x physical VMEM
    # ~48 MiB on v7x (64 MiB phys), ~96 MiB on v5e/v6e (128 MiB phys)
    return int(min(cap * 3 // 4, 96 * 1024 * 1024))


def _plan_inference(e, d):
    """Derive padded dims + exp-table tile from the VMEM budget."""
    dp = _round_up(d, _LANE)
    ep = _round_up(e, _LANE)
    vmem_limit = _vmem_limit_bytes()
    # bytes per exp row per pipeline step: int8 tile (x2 bufs) + bf16 output
    # column slab (x2 bufs) + scale, plus the resident/buffered bf16 query.
    per_row = 2 * dp * 1 + 2 * _TILE_B_MAX * 2 + 8
    avail = max(_LANE * per_row, vmem_limit - 2 * _TILE_B_MAX * dp * 2)
    tile_cap = max(_LANE, (avail // per_row) // _LANE * _LANE)
    tile_e_max = min(_TILE_E_MAX, tile_cap, ep)
    n_tiles = _cdiv(ep, tile_e_max)
    tile_e = _round_up(_cdiv(ep, n_tiles), _LANE)
    ep_pad = n_tiles * tile_e
    return {"dp": dp, "ep": ep, "tile_e": tile_e, "ep_pad": ep_pad,
            "vmem_limit": vmem_limit}


def _l2_normalize_rsqrt(x):
    # x / max(||x||, eps) == x * rsqrt(max(||x||^2, eps^2)); rsqrt -> EUP.
    sumsq = jnp.sum(x * x, axis=-1, keepdims=True)
    return x * jax.lax.rsqrt(jnp.maximum(sumsq, _EPS * _EPS))


# ----------------------------------------------------------------------------
# Kernel 1: training branch -> scalar NT-BXent loss (whole-array, B is small)
# ----------------------------------------------------------------------------
def _cler_loss_kernel(user_ref, item_ref, exp_ref, target_ref, out_ref, *,
                      mu, one_minus_mu, inv_temperature):
    user = user_ref[...].astype(jnp.float32)        # (B, Dp)
    item = item_ref[...].astype(jnp.float32)        # (B, Dp)
    expe = exp_ref[...].astype(jnp.float32)         # (B, Dp)
    tgt_f = target_ref[...].astype(jnp.float32)     # (B, B) int8 -> f32 0/1

    ui_n = _l2_normalize_rsqrt(user * mu + item * one_minus_mu)
    ex_n = _l2_normalize_rsqrt(expe)

    # cosine-similarity logits on the MXU; bf16 inputs (native MXU rate on
    # v6e/v7x), f32 accumulation; contract last dims (no .T / XLU).
    logits = jax.lax.dot_general(
        ui_n.astype(jnp.bfloat16), ex_n.astype(jnp.bfloat16),
        dimension_numbers=(((1,), (1,)), ((), ())),
        preferred_element_type=jnp.float32)          # (B, B)
    m = logits * inv_temperature

    # log_softmax along dim=0 (columns) + log_softmax along dim=1 (rows)
    m0 = m - jnp.max(m, axis=0, keepdims=True)
    ls0 = m0 - jnp.log(jnp.sum(jnp.exp(m0), axis=0, keepdims=True))
    m1 = m - jnp.max(m, axis=1, keepdims=True)
    ls1 = m1 - jnp.log(jnp.sum(jnp.exp(m1), axis=1, keepdims=True))
    loss = ls0 + ls1

    # masked reductions: one weighted sum + one total (neg = total - pos)
    loss_total = jnp.sum(loss, axis=1, keepdims=True)            # (B, 1)
    loss_pos = jnp.sum(loss * tgt_f, axis=1, keepdims=True)      # (B, 1)
    loss_neg = loss_total - loss_pos
    num_pos = jnp.sum(tgt_f, axis=1, keepdims=True)              # (B, 1)
    b = loss.shape[0]
    # NOTE: intentional divergence from the reference ONLY for a degenerate
    # all-positive row (PyTorch would divide by zero there -> inf/NaN).
    num_neg = jnp.maximum(jnp.float32(b) - num_pos, 1.0)

    per_row = loss_pos / num_pos + loss_neg / num_neg            # (B, 1)
    out_ref[...] = -(jnp.sum(per_row, axis=0, keepdims=True) * (1.0 / b))


# ----------------------------------------------------------------------------
# Kernel 2a: inference query prep (mu-mix + L2 norm + bf16), done ONCE
# ----------------------------------------------------------------------------
def _query_norm_kernel(user_ref, item_ref, out_ref, *, mu, one_minus_mu):
    user = user_ref[...].astype(jnp.float32)        # (tile_b, Dp)
    item = item_ref[...].astype(jnp.float32)        # (tile_b, Dp)
    out_ref[...] = _l2_normalize_rsqrt(
        user * mu + item * one_minus_mu).astype(jnp.bfloat16)


# ----------------------------------------------------------------------------
# Kernel 2b: inference tiled cosine logits (pure DMA + MXU body)
# ----------------------------------------------------------------------------
def _cler_logits_kernel(ui_ref, expq_ref, scale_ref, out_ref):
    ui = ui_ref[...]                                  # (tile_b, Dp) bf16
    # int8 -> f32 -> bf16 (per-row dequant scale folded into output columns
    # AFTER the matmul: O(tile_b*tile_e) VPU work instead of O(tile_e*Dp)).
    ex = expq_ref[...].astype(jnp.float32).astype(jnp.bfloat16)  # (tile_e, Dp)
    acc = jax.lax.dot_general(
        ui, ex, dimension_numbers=(((1,), (1,)), ((), ())),
        preferred_element_type=jnp.float32)           # (tile_b, tile_e)
    out_ref[...] = (acc * scale_ref[...]).astype(out_ref.dtype)


# ----------------------------------------------------------------------------
# Parameters & wrappers (glue)
# ----------------------------------------------------------------------------
def make_params(key, user_dim, item_dim, exp_dim, dimension):
    initrange = 0.005
    ku, ki, ke = jax.random.split(key, 3)
    return {
        "user": jax.random.uniform(ku, (user_dim, dimension), jnp.float32,
                                   -initrange, initrange),
        "item": jax.random.uniform(ki, (item_dim, dimension), jnp.float32,
                                   -initrange, initrange),
        "exp": jax.random.uniform(ke, (exp_dim, dimension), jnp.float32,
                                  -initrange, initrange),
    }


def prepare_exp_table(params):
    """L2-normalize + int8-quantize (per-row scales) the exp table ONCE.

    int8 storage halves/quarters the dominant HBM stream vs bf16/f32 on every
    generation; the kernel dequantizes to bf16 in VMEM (no integer MXU), so
    this is also safe on v7x.
    """
    e, d = params["exp"].shape
    plan = _plan_inference(e, d)
    exp = _pad_axis_to(params["exp"].astype(jnp.float32), plan["dp"], 1)
    exp_n = _l2_normalize_rsqrt(exp)
    exp_n = _pad_axis_to(exp_n, plan["ep_pad"], 0)   # zero rows -> zero logits
    maxabs = jnp.max(jnp.abs(exp_n), axis=1, keepdims=True)      # (Ep, 1)
    scale = jnp.maximum(maxabs, 1e-30) / 127.0
    q = jnp.clip(jnp.round(exp_n / scale), -127.0, 127.0).astype(jnp.int8)
    return {"q": q, "scale": scale[:, 0].reshape(1, -1).astype(jnp.float32),
            "e": e, **plan}


def _inference_logits(params, user_emb, item_emb, *, mu, exp_table=None):
    if exp_table is None:
        exp_table = prepare_exp_table(params)
    b = user_emb.shape[0]
    dp, tile_e, ep_pad = exp_table["dp"], exp_table["tile_e"], exp_table["ep_pad"]
    e, vmem_limit = exp_table["e"], exp_table["vmem_limit"]

    bp = _round_up(b, _SUBLANE_BF16)
    tile_b = bp if bp <= _TILE_B_MAX else _TILE_B_MAX   # whole batch resident
    bp = _round_up(bp, tile_b)

    user_p = _pad_axis_to(_pad_axis_to(user_emb.astype(jnp.float32), dp, 1), bp, 0)
    item_p = _pad_axis_to(_pad_axis_to(item_emb.astype(jnp.float32), dp, 1), bp, 0)

    # 1) query mu-mix + normalize + bf16 cast, hoisted OUT of the (i, j) grid.
    ui_bf16 = pl.pallas_call(
        functools.partial(_query_norm_kernel, mu=float(mu),
                          one_minus_mu=float(1.0 - mu)),
        out_shape=jax.ShapeDtypeStruct((bp, dp), jnp.bfloat16),
        grid_spec=pltpu.PrefetchScalarGridSpec(
            num_scalar_prefetch=0, grid=(bp // tile_b,),
            in_specs=[pl.BlockSpec((tile_b, dp), lambda i: (i, 0)),
                      pl.BlockSpec((tile_b, dp), lambda i: (i, 0))],
            out_specs=pl.BlockSpec((tile_b, dp), lambda i: (i, 0))),
        compiler_params=pltpu.CompilerParams(
            dimension_semantics=("parallel",),
            vmem_limit_bytes=vmem_limit),
    )(user_p, item_p)

    # 2) tiled logits: bf16 query x int8 exp tiles (dequantized in VMEM),
    #    bf16 writeback, both grid axes "parallel" (v7x megacore split on E).
    grid = (bp // tile_b, ep_pad // tile_e)
    logits_p = pl.pallas_call(
        _cler_logits_kernel,
        out_shape=jax.ShapeDtypeStruct((bp, ep_pad), jnp.bfloat16),
        grid_spec=pltpu.PrefetchScalarGridSpec(
            num_scalar_prefetch=0, grid=grid,
            in_specs=[
                pl.BlockSpec((tile_b, dp), lambda i, j: (i, 0)),
                pl.BlockSpec((tile_e, dp), lambda i, j: (j, 0)),
                pl.BlockSpec((1, tile_e), lambda i, j: (0, j)),
            ],
            out_specs=pl.BlockSpec((tile_b, tile_e), lambda i, j: (i, j))),
        compiler_params=pltpu.CompilerParams(
            dimension_semantics=("parallel", "parallel"),
            vmem_limit_bytes=vmem_limit),
    )(ui_bf16, exp_table["q"], exp_table["scale"])

    return logits_p[:b, :e]


def cler_forward(params, user_ids, item_ids, exp_ids, pos_indices, *,
                 mu, temperature, topk, exp_table=None):
    # TODO(synk): dropout_rate treated as 0.0 (identity / eval-equivalent).
    # embedding gathers are glue (plain JAX)
    user_emb = jnp.take(params["user"], user_ids, axis=0)
    item_emb = jnp.take(params["item"], item_ids, axis=0)

    if exp_ids is not None:
        # ---------------- training branch ----------------
        exp_emb = jnp.take(params["exp"], exp_ids, axis=0)

        dp = _round_up(user_emb.shape[1], _LANE)
        user_p = _pad_axis_to(user_emb, dp, 1)
        item_p = _pad_axis_to(item_emb, dp, 1)
        exp_p = _pad_axis_to(exp_emb, dp, 1)

        b = user_emb.shape[0]
        # pos_indices ++ diagonal (i, i) pairs, as in nt_bxent_loss
        diag = jnp.tile(jnp.arange(b, dtype=pos_indices.dtype)[:, None], (1, 2))
        all_pos = jnp.concatenate([pos_indices, diag], axis=0)
        target = jnp.zeros((b, b), jnp.int8).at[
            all_pos[:, 0], all_pos[:, 1]].set(1)

        loss = pl.pallas_call(
            functools.partial(_cler_loss_kernel, mu=float(mu),
                              one_minus_mu=float(1.0 - mu),
                              inv_temperature=float(1.0 / temperature)),
            out_shape=jax.ShapeDtypeStruct((1, 1), jnp.float32),
            in_specs=[pl.BlockSpec(memory_space=pltpu.MemorySpace.VMEM)] * 4,
            out_specs=pl.BlockSpec(memory_space=pltpu.MemorySpace.VMEM),
            compiler_params=pltpu.CompilerParams(
                vmem_limit_bytes=_vmem_limit_bytes()),
        )(user_p, item_p, exp_p, target)
        # TODO(synk): for large B (>~1k on v5e/v6e, ~half that on v7x's 64 MiB
        # VMEM), tile the (B,B) logits with a grid + online softmax and build
        # the mask in-kernel from SMEM-prefetched pos_indices.
        return loss[0, 0]
    else:
        # ---------------- inference branch ----------------
        logits = _inference_logits(params, user_emb, item_emb, mu=mu,
                                   exp_table=exp_table)
        # TODO(synk): a fused streaming per-E-tile top-k (VMEM running top-k)
        # would avoid the (B, E) HBM round trip; top-k stays in JAX glue here.
        return jax.lax.top_k(logits.astype(jnp.float32), topk)[1]


# ----------------------------------------------------------------------------
# Pure-JAX references for verification (mirror the PyTorch module / prep)
# ----------------------------------------------------------------------------
def _reference_loss(params, user_ids, item_ids, exp_ids, pos_indices, *,
                    mu, temperature):
    def norm(x):
        n = jnp.sqrt(jnp.sum(x * x, axis=-1, keepdims=True))
        return x / jnp.maximum(n, _EPS)

    user_emb = jnp.take(params["user"], user_ids, axis=0)
    item_emb = jnp.take(params["item"], item_ids, axis=0)
    exp_emb = norm(jnp.take(params["exp"], exp_ids, axis=0))
    ui = norm(user_emb * mu + item_emb * (1.0 - mu))
    m = (ui @ exp_emb.T) / temperature
    b = m.shape[0]
    diag = jnp.tile(jnp.arange(b, dtype=pos_indices.dtype)[:, None], (1, 2))
    all_pos = jnp.concatenate([pos_indices, diag], axis=0)
    target = jnp.zeros((b, b), jnp.float32).at[all_pos[:, 0], all_pos[:, 1]].set(1.0)
    loss = jax.nn.log_softmax(m, axis=0) + jax.nn.log_softmax(m, axis=1)
    pos = target > 0.5
    loss_pos = jnp.sum(jnp.where(pos, loss, 0.0), axis=1)
    loss_neg = jnp.sum(jnp.where(pos, 0.0, loss), axis=1)
    num_pos = target.sum(axis=1)
    num_neg = b - num_pos
    return -(loss_pos / num_pos + loss_neg / num_neg).mean()


def _reference_inference_logits(params, user_emb, item_emb, exp_table, *, mu):
    # same numerics as the kernels: bf16 query, int8-dequantized exp table
    dp = exp_table["dp"]
    ui = _l2_normalize_rsqrt((user_emb * mu + item_emb * (1.0 - mu)
                              ).astype(jnp.float32))
    ui_p = _pad_axis_to(ui, dp, 1).astype(jnp.bfloat16).astype(jnp.float32)
    exp_deq = exp_table["q"].astype(jnp.float32) * exp_table["scale"].reshape(-1, 1)
    return (ui_p @ exp_deq.T)[:, :exp_table["e"]]


if __name__ == "__main__":
    # small deterministic setup
    USER_DIM, ITEM_DIM, EXP_DIM, DIM = 20, 30, 64, 32
    B, P = 8, 6
    MU, TEMPERATURE, TOPK = 0.3, 0.5, 3

    key = jax.random.PRNGKey(0)
    kparam, ku, ki, ke, kp = jax.random.split(key, 5)
    params = make_params(kparam, USER_DIM, ITEM_DIM, EXP_DIM, DIM)

    user_ids = jax.random.randint(ku, (B,), 0, USER_DIM, dtype=jnp.int32)
    item_ids = jax.random.randint(ki, (B,), 0, ITEM_DIM, dtype=jnp.int32)
    exp_ids = jax.random.randint(ke, (B,), 0, EXP_DIM, dtype=jnp.int32)
    pos_indices = jax.random.randint(kp, (P, 2), 0, B, dtype=jnp.int32)

    # ---- training branch (scalar loss) ----
    loss = cler_forward(params, user_ids, item_ids, exp_ids, pos_indices,
                        mu=MU, temperature=TEMPERATURE, topk=TOPK)
    loss = jax.block_until_ready(loss)
    ref = _reference_loss(params, user_ids, item_ids, exp_ids, pos_indices,
                          mu=MU, temperature=TEMPERATURE)
    # tolerance accounts for bf16 MXU inputs (f32 accumulation) in the kernel
    assert np.allclose(np.asarray(loss), np.asarray(ref),
                       rtol=2e-2, atol=2e-2), (loss, ref)

    # ---- inference branch ----
    exp_table = prepare_exp_table(params)          # quantized/normalized ONCE
    user_emb = jnp.take(params["user"], user_ids, axis=0)
    item_emb = jnp.take(params["item"], item_ids, axis=0)

    logits = _inference_logits(params, user_emb, item_emb, mu=MU,
                               exp_table=exp_table)
    logits = jax.block_until_ready(logits)
    ref_logits = _reference_inference_logits(params, user_emb, item_emb,
                                             exp_table, mu=MU)
    assert logits.shape == (B, EXP_DIM)
    assert np.allclose(np.asarray(logits, dtype=np.float32),
                       np.asarray(ref_logits), rtol=5e-2, atol=2e-2)

    topk_idx = cler_forward(params, user_ids, item_ids, None, None,
                            mu=MU, temperature=TEMPERATURE, topk=TOPK,
                            exp_table=exp_table)
    topk_idx = jax.block_until_ready(topk_idx)
    assert topk_idx.shape == (B, TOPK)
    assert np.all((np.asarray(topk_idx) >= 0) & (np.asarray(topk_idx) < EXP_DIM))

    print("KERNEL_OK")
</pallas_src>

<mosaic_0001>
module attributes {stable_mosaic.version = 11 : i64} {
  func.func @_cler_loss_kernel(%arg0: memref<8x128xf32, #tpu.memory_space<vmem>>, %arg1: memref<8x128xf32, #tpu.memory_space<vmem>>, %arg2: memref<8x128xf32, #tpu.memory_space<vmem>>, %arg3: memref<8x8xi8, #tpu.memory_space<vmem>>, %arg4: memref<1x1xf32, #tpu.memory_space<vmem>>) attributes {dimension_semantics = [], scalar_prefetch = 0 : i64, scratch_operands = 0 : i64, tpu.core_type = #tpu.core_type<tc>} {
    %c0 = arith.constant 0 : index
    %c0_0 = arith.constant 0 : index
    %0 = vector.load %arg0[%c0, %c0_0] : memref<8x128xf32, #tpu.memory_space<vmem>>, vector<8x128xf32>
    %c0_1 = arith.constant 0 : index
    %c0_2 = arith.constant 0 : index
    %1 = vector.load %arg1[%c0_1, %c0_2] : memref<8x128xf32, #tpu.memory_space<vmem>>, vector<8x128xf32>
    %c0_3 = arith.constant 0 : index
    %c0_4 = arith.constant 0 : index
    %2 = vector.load %arg2[%c0_3, %c0_4] : memref<8x128xf32, #tpu.memory_space<vmem>>, vector<8x128xf32>
    %c0_5 = arith.constant 0 : index
    %c0_6 = arith.constant 0 : index
    %3 = vector.load %arg3[%c0_5, %c0_6] : memref<8x8xi8, #tpu.memory_space<vmem>>, vector<8x8xi8>
    %4 = arith.sitofp %3 : vector<8x8xi8> to vector<8x8xf32>
    %cst = arith.constant 3.000000e-01 : f32
    %5 = vector.broadcast %cst : f32 to vector<8x128xf32>
    %6 = arith.mulf %0, %5 : vector<8x128xf32>
    %cst_7 = arith.constant 0.699999988 : f32
    %7 = vector.broadcast %cst_7 : f32 to vector<8x128xf32>
    %8 = arith.mulf %1, %7 : vector<8x128xf32>
    %9 = arith.addf %6, %8 : vector<8x128xf32>
    %10 = arith.mulf %9, %9 : vector<8x128xf32>
    %cst_8 = arith.constant dense<0.000000e+00> : vector<8xf32>
    %11 = vector.multi_reduction <add>, %10, %cst_8 [1] : vector<8x128xf32> to vector<8xf32>
    %12 = vector.shape_cast %11 : vector<8xf32> to vector<8x1xf32>
    %cst_9 = arith.constant 1.000000e-24 : f32
    %13 = vector.broadcast %cst_9 : f32 to vector<8x1xf32>
    %14 = arith.maximumf %12, %13 : vector<8x1xf32>
    %15 = math.rsqrt %14 : vector<8x1xf32>
    %16 = vector.broadcast %15 : vector<8x1xf32> to vector<8x128xf32>
    %17 = arith.mulf %9, %16 : vector<8x128xf32>
    %18 = arith.mulf %2, %2 : vector<8x128xf32>
    %cst_10 = arith.constant dense<0.000000e+00> : vector<8xf32>
    %19 = vector.multi_reduction <add>, %18, %cst_10 [1] : vector<8x128xf32> to vector<8xf32>
    %20 = vector.shape_cast %19 : vector<8xf32> to vector<8x1xf32>
    %cst_11 = arith.constant 1.000000e-24 : f32
    %21 = vector.broadcast %cst_11 : f32 to vector<8x1xf32>
    %22 = arith.maximumf %20, %21 : vector<8x1xf32>
    %23 = math.rsqrt %22 : vector<8x1xf32>
    %24 = vector.broadcast %23 : vector<8x1xf32> to vector<8x128xf32>
    %25 = arith.mulf %2, %24 : vector<8x128xf32>
    %26 = arith.truncf %17 : vector<8x128xf32> to vector<8x128xbf16>
    %27 = arith.truncf %25 : vector<8x128xf32> to vector<8x128xbf16>
    %cst_12 = arith.constant dense<0.000000e+00> : vector<8x8xf32>
    %28 = tpu.matmul %26, %27, %cst_12 {dimension_numbers = #tpu.dot_dimension_numbers<[1], [1], [0], [0], [0, 0, 1, 0], [], []>} : vector<8x128xbf16>, vector<8x128xbf16>, vector<8x8xf32> -> vector<8x8xf32>
    %cst_13 = arith.constant 2.000000e+00 : f32
    %29 = vector.broadcast %cst_13 : f32 to vector<8x8xf32>
    %30 = arith.mulf %28, %29 : vector<8x8xf32>
    %cst_14 = arith.constant dense<0xFF800000> : vector<8xf32>
    %31 = vector.multi_reduction <maximumf>, %30, %cst_14 [0] : vector<8x8xf32> to vector<8xf32>
    %32 = vector.shape_cast %31 : vector<8xf32> to vector<1x8xf32>
    %33 = vector.broadcast %32 : vector<1x8xf32> to vector<8x8xf32>
    %34 = arith.subf %30, %33 : vector<8x8xf32>
    %35 = math.exp %34 : vector<8x8xf32>
    %cst_15 = arith.constant dense<0.000000e+00> : vector<8xf32>
    %36 = vector.multi_reduction <add>, %35, %cst_15 [0] : vector<8x8xf32> to vector<8xf32>
    %37 = vector.shape_cast %36 : vector<8xf32> to vector<1x8xf32>
    %38 = math.log %37 : vector<1x8xf32>
    %39 = vector.broadcast %38 : vector<1x8xf32> to vector<8x8xf32>
    %40 = arith.subf %34, %39 : vector<8x8xf32>
    %cst_16 = arith.constant dense<0xFF800000> : vector<8xf32>
    %41 = vector.multi_reduction <maximumf>, %30, %cst_16 [1] : vector<8x8xf32> to vector<8xf32>
    %42 = vector.shape_cast %41 : vector<8xf32> to vector<8x1xf32>
    %43 = vector.broadcast %42 : vector<8x1xf32> to vector<8x8xf32>
    %44 = arith.subf %30, %43 : vector<8x8xf32>
    %45 = math.exp %44 : vector<8x8xf32>
    %cst_17 = arith.constant dense<0.000000e+00> : vector<8xf32>
    %46 = vector.multi_reduction <add>, %45, %cst_17 [1] : vector<8x8xf32> to vector<8xf32>
    %47 = vector.shape_cast %46 : vector<8xf32> to vector<8x1xf32>
    %48 = math.log %47 : vector<8x1xf32>
    %49 = vector.broadcast %48 : vector<8x1xf32> to vector<8x8xf32>
    %50 = arith.subf %44, %49 : vector<8x8xf32>
    %51 = arith.addf %40, %50 : vector<8x8xf32>
    %cst_18 = arith.constant dense<0.000000e+00> : vector<8xf32>
    %52 = vector.multi_reduction <add>, %51, %cst_18 [1] : vector<8x8xf32> to vector<8xf32>
    %53 = vector.shape_cast %52 : vector<8xf32> to vector<8x1xf32>
    %54 = arith.mulf %51, %4 : vector<8x8xf32>
    %cst_19 = arith.constant dense<0.000000e+00> : vector<8xf32>
    %55 = vector.multi_reduction <add>, %54, %cst_19 [1] : vector<8x8xf32> to vector<8xf32>
    %56 = vector.shape_cast %55 : vector<8xf32> to vector<8x1xf32>
    %57 = arith.subf %53, %56 : vector<8x1xf32>
    %cst_20 = arith.constant dense<0.000000e+00> : vector<8xf32>
    %58 = vector.multi_reduction <add>, %4, %cst_20 [1] : vector<8x8xf32> to vector<8xf32>
    %59 = vector.shape_cast %58 : vector<8xf32> to vector<8x1xf32>
    %cst_21 = arith.constant 8.000000e+00 : f32
    %60 = vector.broadcast %cst_21 : f32 to vector<8x1xf32>
    %61 = arith.subf %60, %59 : vector<8x1xf32>
    %cst_22 = arith.constant 1.000000e+00 : f32
    %62 = vector.broadcast %cst_22 : f32 to vector<8x1xf32>
    %63 = arith.maximumf %61, %62 : vector<8x1xf32>
    %64 = arith.divf %56, %59 : vector<8x1xf32>
    %65 = arith.divf %57, %63 : vector<8x1xf32>
    %66 = arith.addf %64, %65 : vector<8x1xf32>
    %cst_23 = arith.constant dense<0.000000e+00> : vector<1xf32>
    %67 = vector.multi_reduction <add>, %66, %cst_23 [0] : vector<8x1xf32> to vector<1xf32>
    %68 = vector.shape_cast %67 : vector<1xf32> to vector<1x1xf32>
    %cst_24 = arith.constant 1.250000e-01 : f32
    %69 = vector.broadcast %cst_24 : f32 to vector<1x1xf32>
    %70 = arith.mulf %68, %69 : vector<1x1xf32>
    %cst_25 = arith.constant 0.000000e+00 : f32
    %71 = vector.broadcast %cst_25 : f32 to vector<1x1xf32>
    %72 = arith.subf %71, %70 : vector<1x1xf32>
    %c0_26 = arith.constant 0 : index
    %c0_27 = arith.constant 0 : index
    %73 = vector.load %arg4[%c0_26, %c0_27] : memref<1x1xf32, #tpu.memory_space<vmem>>, vector<1x1xf32>
    tpu.vector_store %arg4[%c0_26, %c0_27], %72 {strides = array<i32>} : memref<1x1xf32, #tpu.memory_space<vmem>>, vector<1x1xf32>,
    return
  }
}

</mosaic_0001>

<bundles_post_ra>
// kernel: tpu_custom_call.1
= control target key start
LH: loop header
LB: loop body
LE: loop exit
PB: predicated region body
PF: predicated region fallthrough
CT: control target
= control target key end

     0   :  { %9 = vsyncpa [#allocation3], 0  ;;  %s407_s0 = inlined_call_operand.hbm [shape: f32[8,128], index: 0, kind: input, shape index: {}]   ;;  %s408_s1 = inlined_call_operand.hbm [shape: f32[8,128], index: 1, kind: input, shape index: {}]   ;;  %s409_s2 = inlined_call_operand.hbm [shape: f32[8,128], index: 2, kind: input, shape index: {}]   ;;  %s410_s3 = inlined_call_operand.vmem [shape: s8[8,8], index: 3, kind: input, shape index: {}]   ;;  %s411_s4 = inlined_call_operand.hbm [shape: f32[1,1], index: 4, kind: output, shape index: {}]  }
   0x1   :  { %10 = vsyncpa [#allocation6], 0 }
   0x2   :  { %11 = vsyncpa [#allocation4], 0  ;;  %s319_s15 = smov [#allocation5]   ;;  %s320_s17 = smov [#allocation2]  }
   0x3   :  { %s28_s16 = sshll.u32 %s319_s15, 4  ;;  %s18_s18 = sshll.u32 %s320_s17, 4  ;;  %s29_s16 = int_to_ptr.vmem [resolvable:$true] %s28_s16  ;;  %s19_s18 = int_to_ptr.vmem [resolvable:$true] %s18_s18 }
   0x4   :  { %s225_s21 = scalar_lea.hbm %s408_s1, 128 }
   0x5   :  { %p226_p0 = scmp.ne.s32.totalorder %s408_s1, %s225_s21  ;;  %p229_p1 = scmp.lt.u32.totalorder %s225_s21, %s408_s1 }
   0x7   :  { %p231_p2 = pnand %p229_p1, %p226_p0 }
   0x9   :  { %234 = shalt.err (!%p231_p2)
}
   0xa   :  { %s235_s26 = scalar_lea.vmem %s29_s16, 128  ;;  %p240_p4 = scmp.lt.s32.totalorder %s29_s16, %s29_s16 }
   0xb   :  { %p236_p3 = scmp.ne.s32.totalorder %s29_s16, %s235_s26  ;;  %p241_p5 = scmp.lt.s32.totalorder %s235_s26, %s235_s26 }
   0xd   :  { %p242_p6 = por %p241_p5, %p240_p4 }
   0xf   :  { %p243_p7 = pnand %p242_p6, %p236_p3 }
  0x11   :  { %246 = shalt.err (!%p243_p7)
}
  0x12   :  { %31 = dma.hbm_to_vmem [thread:$0]  %s408_s1, 128, %s29_s16, [#allocation6]  }
  0x13   :  { %s247_s5 = scalar_lea.hbm %s407_s0, 128 }
  0x14   :  { %p248_p8 = scmp.ne.s32.totalorder %s407_s0, %s247_s5  ;;  %p251_p9 = scmp.lt.u32.totalorder %s247_s5, %s407_s0 }
  0x16   :  { %p253_p10 = pnand %p251_p9, %p248_p8 }
  0x18   :  { %256 = shalt.err (!%p253_p10)
}
  0x19   :  { %s257_s10 = scalar_lea.vmem %s19_s18, 128  ;;  %p262_p12 = scmp.lt.s32.totalorder %s19_s18, %s19_s18 }
  0x1a   :  { %p258_p11 = scmp.ne.s32.totalorder %s19_s18, %s257_s10  ;;  %p263_p13 = scmp.lt.s32.totalorder %s257_s10, %s257_s10 }
  0x1c   :  { %p264_p0 = por %p263_p13, %p262_p12 }
  0x1e   :  { %p265_p1 = pnand %p264_p0, %p258_p11 }
  0x20   :  { %268 = shalt.err (!%p265_p1)
}
  0x21   :  { %21 = dma.hbm_to_vmem [thread:$0]  %s407_s0, 128, %s19_s18, [#allocation3]  }
  0x22   :  { %s321_s12 = smov [#allocation7]   ;;  %s269_s16 = scalar_lea.hbm %s409_s2, 128 }
  0x23   :  { %s38_s13 = sshll.u32 %s321_s12, 4  ;;  %p270_p2 = scmp.ne.s32.totalorder %s409_s2, %s269_s16  ;;  %s39_s13 = int_to_ptr.vmem [resolvable:$true] %s38_s13 }
  0x24   :  { %p273_p3 = scmp.lt.u32.totalorder %s269_s16, %s409_s2 }
  0x26   :  { %p275_p4 = pnand %p273_p3, %p270_p2 }
  0x28   :  { %278 = shalt.err (!%p275_p4)
}
  0x29   :  { %s279_s22 = scalar_lea.vmem %s39_s13, 128  ;;  %p284_p6 = scmp.lt.s32.totalorder %s39_s13, %s39_s13 }
  0x2a   :  { %p280_p5 = scmp.ne.s32.totalorder %s39_s13, %s279_s22  ;;  %p285_p7 = scmp.lt.s32.totalorder %s279_s22, %s279_s22 }
  0x2c   :  { %p286_p8 = por %p285_p7, %p284_p6 }
  0x2e   :  { %p287_p9 = pnand %p286_p8, %p280_p5 }
  0x30   :  { %290 = shalt.err (!%p287_p9)
}
  0x31   :  { %41 = dma.hbm_to_vmem [thread:$0]  %s409_s2, 128, %s39_s13, [#allocation6]  }
  0x32   :  { %313 = dma.done.wait [#allocation3], 128  }
  0x33   :  { %314 = vsyncadd [#allocation3], 4294967168 }
  0x34   :  { %315 = dma.done.wait [#allocation6], 256  }
  0x35   :  { %316 = vsyncadd [#allocation6], 4294967040  ;;  %v56_v0 = vld [vmem:[#allocation7] sm:$0xff]  ;;  %v54_v1 = vld [vmem:[#allocation2] sm:$0xff]  ;;  %v322_v8 = vmov 0.0   ;;  %vm323_vm0 = vmmov 0  }
  0x36   :  { %v55_v2 = vld [vmem:[#allocation5] sm:$0xff]  ;;  %v69_v3 = vmul.f32 %v56_v0, %v56_v0  ;;  %v60_v4 = vmul.f32 0.3, %v54_v1  ;;  %197 = vmatprep.subr.bf16.mxu0 %v322_v8  ;;  %199 = vmatprep.mubr.msk.bf16.mxu0 %vm323_vm0, %v322_v8  ;;  %vm118_vm1 = vcmask 64512   ;;  %v57_v30 = vld [vmem:[%s410_s3] sm:$0x3] }
  0x37   :  { %v61_v5 = vmul.f32 0.7, %v55_v2  ;;  %v58_v31 = vunpack.c.0.s8 %v57_v30  ;;  %s324_s3 = smov [#allocation8]   ;;  %vm177_vm2 = vcmask 0  }
  0x38   :  { %70 = vadd.xlane.f32.xlu0 %v69_v3  ;;  %s185_s24 = sshll.u32 %s324_s3, 4  ;;  %s186_s24 = int_to_ptr.vmem [resolvable:$true] %s185_s24 }
  0x39   :  { %v62_v6 = vadd.f32 %v61_v5, %v60_v4  ;;  %v59_v32 = vcvt.s32.f32 %v58_v31  ;;  %s291_s25 = scalar_lea.vmem %s186_s24, 16  ;;  %s295_s26 = scalar_lea.vmem %s186_s24, 32 }
  0x3a   :  { %p292_p10 = scmp.ne.s32.totalorder %s186_s24, %s291_s25  ;;  %p296_p11 = scmp.lt.s32.totalorder %s186_s24, %s186_s24 }
  0x3b   :  { %v63_v7 = vmul.f32 %v62_v6, %v62_v6  ;;  %v159_v33 = vsel %vm118_vm1, %v59_v32, 0.0  ;;  %p297_p12 = scmp.lt.s32.totalorder %s295_s26, %s291_s25 }
  0x3d   :  { %64 = vadd.xlane.f32.xlu0 %v63_v7  ;;  %p298_p13 = por %p297_p12, %p296_p11 }
  0x3f   :  { %p299_p0 = pnand %p298_p13, %p292_p10 }
  0x41   :  { %160 = vadd.xlane.f32.xlu0 %v159_v33 }
  0xc5   :  { %v71_v9 = vpop.xlane.xlu0 %70 }
  0xc6   :  { %v72_v10 = vmax.f32 %v71_v9, 1e-24 }
  0xc8   :  { %209 = vrsqrt.f32 %v72_v10 }
  0xca   :  { %v65_v11 = vpop.xlane.xlu0 %64 }
  0xcb   :  { %v66_v12 = vmax.f32 %v65_v11, 1e-24 }
  0xcd   :  { %211 = vrsqrt.f32 %v66_v12 }
  0xce   :  { %v161_v61 = vpop.xlane.xlu0 %160 }
  0xcf   :  { %v162_v62 = vsub.f32 8.0, %v161_v61 }
  0xd1   :  { %v163_v63 = vmax.f32 %v162_v62, 1.0 }
  0xd2   :  { %v210_v13 = vpop.eup %209 }
  0xd3   :  { %v74_v14 = vmul.f32 %v210_v13, %v56_v0 }
  0xd5   :  { %v76_v15 = vpack.c.bf16 %v74_v14, %v74_v14 }
  0xd7   :  { %v212_v16 = vpop.eup %211  ;;  %198 = vmatpush3.bf16.xpose.msra.mxu0 %v76_v15 }
  0xd8   :  { %v68_v17 = vmul.f32 %v212_v16, %v62_v6 }
  0xda   :  { %v75_v18 = vpack.c.bf16 %v68_v17, %v68_v17 }
  0xde   :  { %200 = vmatmul.mubr.bf16.vlgmr.msra.gmra.mrb[0].mxu0 %v75_v18 }
 0x1b1   :  { %v111_v19 = vpop.f32.mrb[0].mxu0 }
 0x1b2   :  { %v117_v20 = vmul.f32 2.0, %v111_v19  ;;  %v201_v21 = vpop.f32.mrb[1].mxu0 }
 0x1b3   :  { %v114_v22 = vpop.f32.mrb[2].mxu0 }
 0x1b4   :  { %v202_v23 = vpop.f32.mrb[3].mxu0  ;;  %v119_v24 = vsel %vm118_vm1, %v117_v20, -inf }
 0x1b5   :  { %139 = vmax.xlane.f32.xlu1 %v119_v24  ;;  %v120_v34 = vrot.slane %v119_v24, 4 }
 0x1b7   :  { %v121_v35 = vmax.f32 %v119_v24, %v120_v34 }
 0x1b9   :  { %v122_v36 = vrot.slane %v121_v35, 2 }
 0x1bb   :  { %v123_v37 = vmax.f32 %v121_v35, %v122_v36 }
 0x1bd   :  { %v124_v38 = vrot.slane %v123_v37, 1 }
 0x1bf   :  { %v125_v39 = vmax.f32 %v123_v37, %v124_v38 }
 0x1c1   :  { %v126_v40 = vsub.f32 %v117_v20, %v125_v39 }
 0x1c3   :  { %v127_v41 = vmul.f32 1.442695, %v126_v40 }
 0x242   :  { %v140_v25 = vpop.xlane.xlu1 %139 }
 0x243   :  { %v141_v26 = vsub.f32 %v117_v20, %v140_v25 }
 0x245   :  { %v142_v27 = vmul.f32 1.442695, %v141_v26 }
 0x247   :  { %213 = vpow2.f32 %v142_v27 }
 0x248   :  { %215 = vpow2.f32 %v127_v41 }
 0x251   :  { %v214_v28 = vpop.eup %213 }
 0x252   :  { %v144_v29 = vsel %vm118_vm1, %v214_v28, 0.0  ;;  %v216_v42 = vpop.eup %215 }
 0x253   :  { %145 = vadd.xlane.f32.xlu1 %v144_v29  ;;  %v129_v43 = vsel %vm118_vm1, %v216_v42, 0.0 }
 0x254   :  { %v130_v44 = vrot.slane %v129_v43, 4 }
 0x256   :  { %v131_v45 = vadd.f32 %v130_v44, %v129_v43 }
 0x258   :  { %v132_v46 = vrot.slane %v131_v45, 2 }
 0x25a   :  { %v133_v47 = vadd.f32 %v132_v46, %v131_v45 }
 0x25c   :  { %v134_v48 = vrot.slane %v133_v47, 1 }
 0x25e   :  { %v135_v49 = vadd.f32 %v134_v48, %v133_v47 }
 0x260   :  { %217 = vlog2.f32 %v135_v49 }
 0x26a   :  { %v218_v51 = vpop.eup %217 }
 0x26b   :  { %v137_v52 = vmul.f32 0.6931472, %v218_v51 }
 0x26d   :  { %v138_v55 = vsub.f32 %v126_v40, %v137_v52 }
 0x2e0   :  { %v146_v50 = vpop.xlane.xlu1 %145 }
 0x2e1   :  { %219 = vlog2.f32 %v146_v50 }
 0x2e2   :  { %221 = vrcp.f32 %v163_v63 }
 0x2e3   :  { %223 = vrcp.f32 %v161_v61 }
 0x2eb   :  { %v220_v53 = vpop.eup %219 }
 0x2ec   :  { %v148_v54 = vmul.f32 0.6931472, %v220_v53  ;;  %v222_v0 = vpop.eup %221 }
 0x2ed   :  { %v224_v4 = vpop.eup %223 }
 0x2ee   :  { %v149_v56 = vsub.f32 %v141_v26, %v148_v54 }
 0x2f0   :  { %v150_v57 = vadd.f32 %v149_v56, %v138_v55 }
 0x2f2   :  { %v151_v58 = vsel %vm118_vm1, %v150_v57, 0.0  ;;  %v154_v59 = vmul.f32 %v150_v57, %v59_v32 }
 0x2f3   :  { %152 = vadd.xlane.f32.xlu1 %v151_v58 }
 0x2f4   :  { %v155_v60 = vsel %vm118_vm1, %v154_v59, 0.0 }
 0x2f5   :  { %156 = vadd.xlane.f32.xlu0 %v155_v60 }
 0x380   :  { %v153_v1 = vpop.xlane.xlu1 %152 }
 0x382   :  { %v157_v2 = vpop.xlane.xlu0 %156 }
 0x383   :  { %v158_v3 = vsub.f32 %v153_v1, %v157_v2  ;;  %v165_v5 = vmul.f32 %v224_v4, %v157_v2 }
 0x385   :  { %v167_v6 = vmul.f32 %v222_v0, %v158_v3 }
 0x387   :  { %v168_v7 = vadd.f32 %v167_v6, %v165_v5 }
 0x389   :  { %v169_v8 = vrot.slane %v168_v7, 4 }
 0x38b   :  { %v170_v9 = vadd.f32 %v169_v8, %v168_v7 }
 0x38d   :  { %v171_v10 = vrot.slane %v170_v9, 2 }
 0x38f   :  { %v172_v11 = vadd.f32 %v171_v10, %v170_v9 }
 0x391   :  { %v173_v12 = vrot.slane %v172_v11, 1 }
 0x393   :  { %v174_v13 = vadd.f32 %v173_v12, %v172_v11 }
 0x395   :  { %v175_v14 = vmul.f32 0.125, %v174_v13 }
 0x397   :  { %v176_v15 = vsub.f32 0.0, %v175_v14 }
 0x399   :  { %178 = vst.msk [vmem:[#allocation8] sm:$0x1] %vm177_vm2, %v176_v15 }
 0x39a   :  { %302 = shalt.err (!%p299_p0)
}
 0x39b   :  { %s303_s29 = scalar_lea.hbm %s411_s4, 16 }
 0x39c   :  { %p304_p1 = scmp.ne.s32.totalorder %s411_s4, %s303_s29  ;;  %p307_p2 = scmp.lt.u32.totalorder %s303_s29, %s411_s4 }
 0x39e   :  { %p309_p3 = pnand %p307_p2, %p304_p1 }
 0x3a0   :  { %312 = shalt.err (!%p309_p3)
}
 0x3a1   :  { %188 = dma.vmem_to_hbm [thread:$0]  %s186_s24, 16, %s411_s4, [#allocation4]  }
 0x3a2   :  { %317 = dma.done.wait [#allocation4], 16  }
 0x3a3   :  { %318 = vsyncadd [#allocation4], 4294967280 }
 0x3a4   :  { %192 = vsyncpa [#allocation3], 1 }
 0x3a5   :  { %193 = vsyncpa [#allocation6], 1 }
 0x3a6   :  { %194 = vsyncpa [#allocation4], 1 }

</bundles_post_ra>
